<compile_context>
chip_gen: v7x
topology: tpu7x:2x2x1
jax: 0.10.0
libtpu: 0.0.40
codegen_flags: <defaults>
</compile_context>

<pallas_src>
import math
import functools

import numpy as np
import jax
import jax.numpy as jnp
from jax.experimental import pallas as pl
from jax.experimental.pallas import tpu as pltpu

LN_EPS = 1e-5


def _erf(x):
    # Abramowitz & Stegun 7.1.26 polynomial erf (max abs err ~1.5e-7).
    a1, a2, a3, a4, a5 = 0.254829592, -0.284496736, 1.421413741, -1.453152027, 1.061405429
    p = 0.3275911
    sgn = jnp.where(x >= 0.0, 1.0, -1.0)
    ax = jnp.abs(x)
    t = 1.0 / (1.0 + p * ax)
    poly = ((((a5 * t + a4) * t + a3) * t + a2) * t + a1) * t
    return sgn * (1.0 - poly * jnp.exp(-ax * ax))


def _gelu_exact(x):
    return 0.5 * x * (1.0 + _erf(x * (1.0 / math.sqrt(2.0))))


# ---------------------------------------------------------------------------
# Fused ResBlock kernel: time/state embeds + layer1 + FiLM + GELU + layer2 + residual
# ---------------------------------------------------------------------------
def resblock_kernel(x_ref, t_ref, s_ref, wt_ref, ws_ref, w1_ref, w2_ref, vec_ref,
                    out_ref, *, d, eps):
    bf16 = jnp.bfloat16

    x = x_ref[...]                     # (TB, D)  f32
    t = t_ref[...]                     # (TB, Tt) f32
    s = s_ref[...]                     # (TB, Ts) f32

    vecs = vec_ref[...]                # (8, 2D)  f32 -- packed bias / LN affine vectors
    b_time = vecs[0:1, :]              # (1, 2D)
    b_state = vecs[1:2, :d]            # (1, D)
    b1 = vecs[2:3, :d]
    b2 = vecs[3:4, :d]
    g = vecs[4:5, :d]
    beta = vecs[5:6, :d]

    w1 = w1_ref[...]                   # (2D, D) bf16; rows 0:D multiply x, rows D:2D s_embed

    def layer_norm(v):                 # shared gamma/beta (single nn.LayerNorm in the module)
        mu = jnp.mean(v, axis=-1, keepdims=True)
        var = jnp.mean(jnp.square(v - mu), axis=-1, keepdims=True)
        return (v - mu) * jax.lax.rsqrt(var + eps) * g + beta

    # time_layer -> FiLM scale/shift (single stacked weight, static lane slices)
    t_proj = jnp.dot(t.astype(bf16), wt_ref[...],
                     preferred_element_type=jnp.float32) + b_time        # (TB, 2D)
    scale = t_proj[:, :d]
    shift = t_proj[:, d:]

    # state_layer + LayerNorm
    s_embed = layer_norm(
        jnp.dot(s.astype(bf16), ws_ref[...],
                preferred_element_type=jnp.float32) + b_state)

    # layer1(cat([x, s_embed])) as two matmuls on the row-split weight (no concat)
    h = (jnp.dot(x.astype(bf16), w1[:d, :], preferred_element_type=jnp.float32)
         + jnp.dot(s_embed.astype(bf16), w1[d:, :], preferred_element_type=jnp.float32)
         + b1)
    h = layer_norm(h)

    # FiLM modulation + exact GELU
    h = h * (scale + 1.0) + shift
    h = _gelu_exact(h)

    # layer2 + LayerNorm + GELU + residual
    h = jnp.dot(h.astype(bf16), w2_ref[...], preferred_element_type=jnp.float32) + b2
    h = layer_norm(h)
    h = _gelu_exact(h)
    out_ref[...] = (h + x).astype(out_ref.dtype)


# ---------------------------------------------------------------------------
# One-time parameter preparation (hoisted out of the per-call path)
# ---------------------------------------------------------------------------
def prepare_params(p, input_dim):
    """Transpose / pack the PyTorch-layout params once; store the kernel-ready tensors."""
    D = input_dim
    f32, bf16 = jnp.float32, jnp.bfloat16

    wt_t = jnp.asarray(p["w_time"], f32).T.astype(bf16)    # (Tt, 2D)
    ws_t = jnp.asarray(p["w_state"], f32).T.astype(bf16)   # (Ts, D)
    w1_t = jnp.asarray(p["w1"], f32).T.astype(bf16)        # (2D, D)
    w2_t = jnp.asarray(p["w2"], f32).T.astype(bf16)        # (D, D)

    vecs = jnp.zeros((8, 2 * D), f32)
    vecs = vecs.at[0, :].set(jnp.asarray(p["b_time"], f32))        # [bt_scale | bt_shift]
    vecs = vecs.at[1, :D].set(jnp.asarray(p["b_state"], f32))
    vecs = vecs.at[2, :D].set(jnp.asarray(p["b1"], f32))
    vecs = vecs.at[3, :D].set(jnp.asarray(p["b2"], f32))
    vecs = vecs.at[4, :D].set(jnp.asarray(p["ln_g"], f32))
    vecs = vecs.at[5, :D].set(jnp.asarray(p["ln_b"], f32))

    return {"wt_t": wt_t, "ws_t": ws_t, "w1_t": w1_t, "w2_t": w2_t, "vecs": vecs}


# ---------------------------------------------------------------------------
# Forward wrapper: single pallas_call, batch grid, weights resident in VMEM
# ---------------------------------------------------------------------------
def resblock_forward(x, t, s, pp):
    B, D = x.shape
    Tt = t.shape[1]
    Ts = s.shape[1]

    # Batch tile: whole batch if small, else 256-row tiles (v6e/v7x MXU M dim); must
    # satisfy the (8,128) rule (full dim or multiple of 8).
    tile_b = B if B <= 256 else 256
    assert tile_b == B or tile_b % 8 == 0
    grid = (pl.cdiv(B, tile_b),)

    matmul_flops = 2 * B * (Tt * 2 * D + Ts * D + 2 * D * D + D * D)
    cost = pl.CostEstimate(
        flops=int(matmul_flops + 40 * B * D),
        transcendentals=int(3 * B * D),
        bytes_accessed=int(4 * (x.size + t.size + s.size + B * D)
                           + 2 * (pp["wt_t"].size + pp["ws_t"].size
                                  + pp["w1_t"].size + pp["w2_t"].size)
                           + 4 * pp["vecs"].size))

    return pl.pallas_call(
        functools.partial(resblock_kernel, d=D, eps=LN_EPS),
        out_shape=jax.ShapeDtypeStruct((B, D), jnp.float32),
        grid=grid,
        in_specs=[
            pl.BlockSpec((tile_b, D), lambda i: (i, 0)),        # x
            pl.BlockSpec((tile_b, Tt), lambda i: (i, 0)),       # t
            pl.BlockSpec((tile_b, Ts), lambda i: (i, 0)),       # s
            pl.BlockSpec((Tt, 2 * D), lambda i: (0, 0)),        # stacked time weight (resident)
            pl.BlockSpec((Ts, D), lambda i: (0, 0)),            # state weight (resident)
            pl.BlockSpec((2 * D, D), lambda i: (0, 0)),         # layer1 weight (resident)
            pl.BlockSpec((D, D), lambda i: (0, 0)),             # layer2 weight (resident)
            pl.BlockSpec((8, 2 * D), lambda i: (0, 0)),         # packed bias/LN vectors
        ],
        out_specs=pl.BlockSpec((tile_b, D), lambda i: (i, 0)),
        compiler_params=pltpu.CompilerParams(
            dimension_semantics=("parallel",)),                 # both TCs on v7x
        cost_estimate=cost,
    )(x, t, s, pp["wt_t"], pp["ws_t"], pp["w1_t"], pp["w2_t"], pp["vecs"])


# ---------------------------------------------------------------------------
# Pure-JAX reference (same math; matmul dtype selectable for a like-for-like check)
# ---------------------------------------------------------------------------
def reference(x, t, s, p, *, matmul_dtype=jnp.float32, precision=None):
    D = x.shape[-1]

    def ln(v):
        mu = v.mean(-1, keepdims=True)
        var = ((v - mu) ** 2).mean(-1, keepdims=True)
        return (v - mu) / jnp.sqrt(var + LN_EPS) * p["ln_g"] + p["ln_b"]

    def dot(a, b):
        return jnp.dot(a.astype(matmul_dtype), b.astype(matmul_dtype),
                       precision=precision, preferred_element_type=jnp.float32)

    t_embed = dot(t, p["w_time"].T) + p["b_time"]
    s_embed = ln(dot(s, p["w_state"].T) + p["b_state"])
    h = jnp.concatenate([x, s_embed], axis=1)
    h = dot(h, p["w1"].T) + p["b1"]
    h = ln(h)
    scale, shift = t_embed[:, :D], t_embed[:, D:]
    h = h * (scale + 1.0) + shift
    h = jax.nn.gelu(h, approximate=False)
    h = dot(h, p["w2"].T) + p["b2"]
    h = ln(h)
    h = jax.nn.gelu(h, approximate=False)
    return h + x


if __name__ == "__main__":
    # Small shapes consistent with the module: batch=8, input_dim=32,
    # t_embed_dim=16, state_embed_dim=24.
    B, input_dim, t_embed_dim, state_embed_dim = 8, 32, 16, 24

    key = jax.random.PRNGKey(0)
    ks = jax.random.split(key, 16)

    def w(k, shape, scale=0.1):
        return (scale * jax.random.normal(k, shape)).astype(jnp.float32)

    params = {
        "w_time": w(ks[0], (2 * input_dim, t_embed_dim)),
        "b_time": w(ks[1], (2 * input_dim,)),
        "w_state": w(ks[2], (input_dim, state_embed_dim)),
        "b_state": w(ks[3], (input_dim,)),
        "w1": w(ks[4], (input_dim, 2 * input_dim)),
        "b1": w(ks[5], (input_dim,)),
        "w2": w(ks[6], (input_dim, input_dim)),
        "b2": w(ks[7], (input_dim,)),
        "ln_g": 1.0 + w(ks[8], (input_dim,)),
        "ln_b": w(ks[9], (input_dim,)),
    }
    x = jax.random.normal(ks[10], (B, input_dim), dtype=jnp.float32)
    t = jax.random.normal(ks[11], (B, t_embed_dim), dtype=jnp.float32)
    s = jax.random.normal(ks[12], (B, state_embed_dim), dtype=jnp.float32)

    # One-time parameter preparation (outside the per-call path).
    pp = jax.block_until_ready(prepare_params(params, input_dim))

    fwd = jax.jit(resblock_forward)
    out = jax.block_until_ready(fwd(x, t, s, pp))
    assert out.shape == (B, input_dim)

    # Strict check against a reference using the same bf16-MXU-input convention
    # (verifies the fused kernel math: LN / FiLM / GELU / residual).
    ref_bf16 = reference(x, t, s, params, matmul_dtype=jnp.bfloat16)
    np.testing.assert_allclose(np.asarray(out), np.asarray(ref_bf16), rtol=3e-3, atol=3e-3)

    # Loose check against the exact f32 module semantics (bounds the mixed-precision error
    # introduced by single-pass bf16 MXU inputs).
    ref_f32 = reference(x, t, s, params, matmul_dtype=jnp.float32,
                        precision=jax.lax.Precision.HIGHEST)
    np.testing.assert_allclose(np.asarray(out), np.asarray(ref_f32), rtol=5e-2, atol=5e-2)

    print("KERNEL_OK")
</pallas_src>

<mosaic_0001>
module attributes {stable_mosaic.version = 11 : i64} {
  func.func @resblock_kernel(%arg0: i32, %arg1: memref<8x32xf32, #tpu.memory_space<vmem>>, %arg2: memref<8x16xf32, #tpu.memory_space<vmem>>, %arg3: memref<8x24xf32, #tpu.memory_space<vmem>>, %arg4: memref<16x64xbf16, #tpu.memory_space<vmem>>, %arg5: memref<24x32xbf16, #tpu.memory_space<vmem>>, %arg6: memref<64x32xbf16, #tpu.memory_space<vmem>>, %arg7: memref<32x32xbf16, #tpu.memory_space<vmem>>, %arg8: memref<8x64xf32, #tpu.memory_space<vmem>>, %arg9: memref<8x32xf32, #tpu.memory_space<vmem>>) attributes {dimension_semantics = [#tpu.dimension_semantics<parallel>], iteration_bounds = array<i64: 1>, scalar_prefetch = 0 : i64, scratch_operands = 0 : i64, tpu.core_type = #tpu.core_type<tc>, window_params = [{transform_indices = @transform_0, window_bounds = array<i64: 8, 32>}, {transform_indices = @transform_1, window_bounds = array<i64: 8, 16>}, {transform_indices = @transform_2, window_bounds = array<i64: 8, 24>}, {pipeline_mode = #tpu.pipeline_mode<synchronous>, transform_indices = @transform_3, window_bounds = array<i64: 16, 64>}, {pipeline_mode = #tpu.pipeline_mode<synchronous>, transform_indices = @transform_4, window_bounds = array<i64: 24, 32>}, {pipeline_mode = #tpu.pipeline_mode<synchronous>, transform_indices = @transform_5, window_bounds = array<i64: 64, 32>}, {pipeline_mode = #tpu.pipeline_mode<synchronous>, transform_indices = @transform_6, window_bounds = array<i64: 32, 32>}, {pipeline_mode = #tpu.pipeline_mode<synchronous>, transform_indices = @transform_7, window_bounds = array<i64: 8, 64>}, {transform_indices = @transform_8, window_bounds = array<i64: 8, 32>}]} {
    %c0 = arith.constant 0 : index
    %c0_0 = arith.constant 0 : index
    %0 = vector.load %arg1[%c0, %c0_0] : memref<8x32xf32, #tpu.memory_space<vmem>>, vector<8x32xf32>
    %c0_1 = arith.constant 0 : index
    %c0_2 = arith.constant 0 : index
    %1 = vector.load %arg2[%c0_1, %c0_2] : memref<8x16xf32, #tpu.memory_space<vmem>>, vector<8x16xf32>
    %c0_3 = arith.constant 0 : index
    %c0_4 = arith.constant 0 : index
    %2 = vector.load %arg3[%c0_3, %c0_4] : memref<8x24xf32, #tpu.memory_space<vmem>>, vector<8x24xf32>
    %c0_5 = arith.constant 0 : index
    %c0_6 = arith.constant 0 : index
    %3 = vector.load %arg8[%c0_5, %c0_6] : memref<8x64xf32, #tpu.memory_space<vmem>>, vector<8x64xf32>
    %4 = vector.extract_strided_slice %3 {offsets = [0, 0], sizes = [1, 64], strides = [1, 1]} : vector<8x64xf32> to vector<1x64xf32>
    %5 = vector.extract_strided_slice %3 {offsets = [1, 0], sizes = [1, 32], strides = [1, 1]} : vector<8x64xf32> to vector<1x32xf32>
    %6 = vector.extract_strided_slice %3 {offsets = [2, 0], sizes = [1, 32], strides = [1, 1]} : vector<8x64xf32> to vector<1x32xf32>
    %7 = vector.extract_strided_slice %3 {offsets = [3, 0], sizes = [1, 32], strides = [1, 1]} : vector<8x64xf32> to vector<1x32xf32>
    %8 = vector.extract_strided_slice %3 {offsets = [4, 0], sizes = [1, 32], strides = [1, 1]} : vector<8x64xf32> to vector<1x32xf32>
    %9 = vector.extract_strided_slice %3 {offsets = [5, 0], sizes = [1, 32], strides = [1, 1]} : vector<8x64xf32> to vector<1x32xf32>
    %c0_7 = arith.constant 0 : index
    %c0_8 = arith.constant 0 : index
    %10 = vector.load %arg6[%c0_7, %c0_8] : memref<64x32xbf16, #tpu.memory_space<vmem>>, vector<64x32xbf16>
    %11 = arith.truncf %1 : vector<8x16xf32> to vector<8x16xbf16>
    %c0_9 = arith.constant 0 : index
    %c0_10 = arith.constant 0 : index
    %12 = vector.load %arg4[%c0_9, %c0_10] : memref<16x64xbf16, #tpu.memory_space<vmem>>, vector<16x64xbf16>
    %cst = arith.constant dense<0.000000e+00> : vector<8x64xf32>
    %13 = tpu.matmul %11, %12, %cst {dimension_numbers = #tpu.dot_dimension_numbers<[1], [0], [0], [1], [0, 0, 1, 1], [], []>} : vector<8x16xbf16>, vector<16x64xbf16>, vector<8x64xf32> -> vector<8x64xf32>
    %14 = vector.broadcast %4 : vector<1x64xf32> to vector<8x64xf32>
    %15 = arith.addf %13, %14 : vector<8x64xf32>
    %16 = vector.extract_strided_slice %15 {offsets = [0, 0], sizes = [8, 32], strides = [1, 1]} : vector<8x64xf32> to vector<8x32xf32>
    %17 = vector.extract_strided_slice %15 {offsets = [0, 32], sizes = [8, 32], strides = [1, 1]} : vector<8x64xf32> to vector<8x32xf32>
    %18 = arith.truncf %2 : vector<8x24xf32> to vector<8x24xbf16>
    %c0_11 = arith.constant 0 : index
    %c0_12 = arith.constant 0 : index
    %19 = vector.load %arg5[%c0_11, %c0_12] : memref<24x32xbf16, #tpu.memory_space<vmem>>, vector<24x32xbf16>
    %cst_13 = arith.constant dense<0.000000e+00> : vector<8x32xf32>
    %20 = tpu.matmul %18, %19, %cst_13 {dimension_numbers = #tpu.dot_dimension_numbers<[1], [0], [0], [1], [0, 0, 1, 1], [], []>} : vector<8x24xbf16>, vector<24x32xbf16>, vector<8x32xf32> -> vector<8x32xf32>
    %21 = vector.broadcast %5 : vector<1x32xf32> to vector<8x32xf32>
    %22 = arith.addf %20, %21 : vector<8x32xf32>
    %cst_14 = arith.constant dense<0.000000e+00> : vector<8xf32>
    %23 = vector.multi_reduction <add>, %22, %cst_14 [1] : vector<8x32xf32> to vector<8xf32>
    %24 = vector.shape_cast %23 : vector<8xf32> to vector<8x1xf32>
    %cst_15 = arith.constant 3.200000e+01 : f32
    %25 = vector.broadcast %cst_15 : f32 to vector<8x1xf32>
    %26 = arith.divf %24, %25 : vector<8x1xf32>
    %27 = vector.broadcast %26 : vector<8x1xf32> to vector<8x32xf32>
    %28 = arith.subf %22, %27 : vector<8x32xf32>
    %29 = arith.mulf %28, %28 : vector<8x32xf32>
    %cst_16 = arith.constant dense<0.000000e+00> : vector<8xf32>
    %30 = vector.multi_reduction <add>, %29, %cst_16 [1] : vector<8x32xf32> to vector<8xf32>
    %31 = vector.shape_cast %30 : vector<8xf32> to vector<8x1xf32>
    %cst_17 = arith.constant 3.200000e+01 : f32
    %32 = vector.broadcast %cst_17 : f32 to vector<8x1xf32>
    %33 = arith.divf %31, %32 : vector<8x1xf32>
    %34 = vector.broadcast %26 : vector<8x1xf32> to vector<8x32xf32>
    %35 = arith.subf %22, %34 : vector<8x32xf32>
    %cst_18 = arith.constant 9.99999974E-6 : f32
    %36 = vector.broadcast %cst_18 : f32 to vector<8x1xf32>
    %37 = arith.addf %33, %36 : vector<8x1xf32>
    %38 = math.rsqrt %37 : vector<8x1xf32>
    %39 = vector.broadcast %38 : vector<8x1xf32> to vector<8x32xf32>
    %40 = arith.mulf %35, %39 : vector<8x32xf32>
    %41 = vector.broadcast %8 : vector<1x32xf32> to vector<8x32xf32>
    %42 = arith.mulf %40, %41 : vector<8x32xf32>
    %43 = vector.broadcast %9 : vector<1x32xf32> to vector<8x32xf32>
    %44 = arith.addf %42, %43 : vector<8x32xf32>
    %45 = arith.truncf %0 : vector<8x32xf32> to vector<8x32xbf16>
    %46 = vector.extract_strided_slice %10 {offsets = [0, 0], sizes = [32, 32], strides = [1, 1]} : vector<64x32xbf16> to vector<32x32xbf16>
    %cst_19 = arith.constant dense<0.000000e+00> : vector<8x32xf32>
    %47 = tpu.matmul %45, %46, %cst_19 {dimension_numbers = #tpu.dot_dimension_numbers<[1], [0], [0], [1], [0, 0, 1, 1], [], []>} : vector<8x32xbf16>, vector<32x32xbf16>, vector<8x32xf32> -> vector<8x32xf32>
    %48 = arith.truncf %44 : vector<8x32xf32> to vector<8x32xbf16>
    %49 = vector.extract_strided_slice %10 {offsets = [32, 0], sizes = [32, 32], strides = [1, 1]} : vector<64x32xbf16> to vector<32x32xbf16>
    %cst_20 = arith.constant dense<0.000000e+00> : vector<8x32xf32>
    %50 = tpu.matmul %48, %49, %cst_20 {dimension_numbers = #tpu.dot_dimension_numbers<[1], [0], [0], [1], [0, 0, 1, 1], [], []>} : vector<8x32xbf16>, vector<32x32xbf16>, vector<8x32xf32> -> vector<8x32xf32>
    %51 = arith.addf %47, %50 : vector<8x32xf32>
    %52 = vector.broadcast %6 : vector<1x32xf32> to vector<8x32xf32>
    %53 = arith.addf %51, %52 : vector<8x32xf32>
    %cst_21 = arith.constant dense<0.000000e+00> : vector<8xf32>
    %54 = vector.multi_reduction <add>, %53, %cst_21 [1] : vector<8x32xf32> to vector<8xf32>
    %55 = vector.shape_cast %54 : vector<8xf32> to vector<8x1xf32>
    %cst_22 = arith.constant 3.200000e+01 : f32
    %56 = vector.broadcast %cst_22 : f32 to vector<8x1xf32>
    %57 = arith.divf %55, %56 : vector<8x1xf32>
    %58 = vector.broadcast %57 : vector<8x1xf32> to vector<8x32xf32>
    %59 = arith.subf %53, %58 : vector<8x32xf32>
    %60 = arith.mulf %59, %59 : vector<8x32xf32>
    %cst_23 = arith.constant dense<0.000000e+00> : vector<8xf32>
    %61 = vector.multi_reduction <add>, %60, %cst_23 [1] : vector<8x32xf32> to vector<8xf32>
    %62 = vector.shape_cast %61 : vector<8xf32> to vector<8x1xf32>
    %cst_24 = arith.constant 3.200000e+01 : f32
    %63 = vector.broadcast %cst_24 : f32 to vector<8x1xf32>
    %64 = arith.divf %62, %63 : vector<8x1xf32>
    %65 = vector.broadcast %57 : vector<8x1xf32> to vector<8x32xf32>
    %66 = arith.subf %53, %65 : vector<8x32xf32>
    %cst_25 = arith.constant 9.99999974E-6 : f32
    %67 = vector.broadcast %cst_25 : f32 to vector<8x1xf32>
    %68 = arith.addf %64, %67 : vector<8x1xf32>
    %69 = math.rsqrt %68 : vector<8x1xf32>
    %70 = vector.broadcast %69 : vector<8x1xf32> to vector<8x32xf32>
    %71 = arith.mulf %66, %70 : vector<8x32xf32>
    %72 = vector.broadcast %8 : vector<1x32xf32> to vector<8x32xf32>
    %73 = arith.mulf %71, %72 : vector<8x32xf32>
    %74 = vector.broadcast %9 : vector<1x32xf32> to vector<8x32xf32>
    %75 = arith.addf %73, %74 : vector<8x32xf32>
    %cst_26 = arith.constant 1.000000e+00 : f32
    %76 = vector.broadcast %cst_26 : f32 to vector<8x32xf32>
    %77 = arith.addf %16, %76 : vector<8x32xf32>
    %78 = arith.mulf %75, %77 : vector<8x32xf32>
    %79 = arith.addf %78, %17 : vector<8x32xf32>
    %cst_27 = arith.constant 5.000000e-01 : f32
    %80 = vector.broadcast %cst_27 : f32 to vector<8x32xf32>
    %81 = arith.mulf %80, %79 : vector<8x32xf32>
    %cst_28 = arith.constant 0.707106769 : f32
    %82 = vector.broadcast %cst_28 : f32 to vector<8x32xf32>
    %83 = arith.mulf %79, %82 : vector<8x32xf32>
    %cst_29 = arith.constant 0.000000e+00 : f32
    %84 = vector.broadcast %cst_29 : f32 to vector<8x32xf32>
    %85 = arith.cmpf oge, %83, %84 : vector<8x32xf32>
    %cst_30 = arith.constant 1.000000e+00 : f32
    %cst_31 = arith.constant -1.000000e+00 : f32
    %86 = vector.broadcast %cst_30 : f32 to vector<8x32xf32>
    %87 = vector.broadcast %cst_31 : f32 to vector<8x32xf32>
    %88 = arith.select %85, %86, %87 : vector<8x32xi1>, vector<8x32xf32>
    %89 = math.absf %83 : vector<8x32xf32>
    %cst_32 = arith.constant 0.327591091 : f32
    %90 = vector.broadcast %cst_32 : f32 to vector<8x32xf32>
    %91 = arith.mulf %90, %89 : vector<8x32xf32>
    %cst_33 = arith.constant 1.000000e+00 : f32
    %92 = vector.broadcast %cst_33 : f32 to vector<8x32xf32>
    %93 = arith.addf %92, %91 : vector<8x32xf32>
    %cst_34 = arith.constant 1.000000e+00 : f32
    %94 = vector.broadcast %cst_34 : f32 to vector<8x32xf32>
    %95 = arith.divf %94, %93 : vector<8x32xf32>
    %cst_35 = arith.constant 1.06140542 : f32
    %96 = vector.broadcast %cst_35 : f32 to vector<8x32xf32>
    %97 = arith.mulf %96, %95 : vector<8x32xf32>
    %cst_36 = arith.constant -1.45315206 : f32
    %98 = vector.broadcast %cst_36 : f32 to vector<8x32xf32>
    %99 = arith.addf %97, %98 : vector<8x32xf32>
    %100 = arith.mulf %99, %95 : vector<8x32xf32>
    %cst_37 = arith.constant 1.42141378 : f32
    %101 = vector.broadcast %cst_37 : f32 to vector<8x32xf32>
    %102 = arith.addf %100, %101 : vector<8x32xf32>
    %103 = arith.mulf %102, %95 : vector<8x32xf32>
    %cst_38 = arith.constant -0.284496725 : f32
    %104 = vector.broadcast %cst_38 : f32 to vector<8x32xf32>
    %105 = arith.addf %103, %104 : vector<8x32xf32>
    %106 = arith.mulf %105, %95 : vector<8x32xf32>
    %cst_39 = arith.constant 0.254829586 : f32
    %107 = vector.broadcast %cst_39 : f32 to vector<8x32xf32>
    %108 = arith.addf %106, %107 : vector<8x32xf32>
    %109 = arith.mulf %108, %95 : vector<8x32xf32>
    %cst_40 = arith.constant 0.000000e+00 : f32
    %110 = vector.broadcast %cst_40 : f32 to vector<8x32xf32>
    %111 = arith.subf %110, %89 : vector<8x32xf32>
    %112 = arith.mulf %111, %89 : vector<8x32xf32>
    %113 = math.exp %112 : vector<8x32xf32>
    %114 = arith.mulf %109, %113 : vector<8x32xf32>
    %cst_41 = arith.constant 1.000000e+00 : f32
    %115 = vector.broadcast %cst_41 : f32 to vector<8x32xf32>
    %116 = arith.subf %115, %114 : vector<8x32xf32>
    %117 = arith.mulf %88, %116 : vector<8x32xf32>
    %cst_42 = arith.constant 1.000000e+00 : f32
    %118 = vector.broadcast %cst_42 : f32 to vector<8x32xf32>
    %119 = arith.addf %118, %117 : vector<8x32xf32>
    %120 = arith.mulf %81, %119 : vector<8x32xf32>
    %121 = arith.truncf %120 : vector<8x32xf32> to vector<8x32xbf16>
    %c0_43 = arith.constant 0 : index
    %c0_44 = arith.constant 0 : index
    %122 = vector.load %arg7[%c0_43, %c0_44] : memref<32x32xbf16, #tpu.memory_space<vmem>>, vector<32x32xbf16>
    %cst_45 = arith.constant dense<0.000000e+00> : vector<8x32xf32>
    %123 = tpu.matmul %121, %122, %cst_45 {dimension_numbers = #tpu.dot_dimension_numbers<[1], [0], [0], [1], [0, 0, 1, 1], [], []>} : vector<8x32xbf16>, vector<32x32xbf16>, vector<8x32xf32> -> vector<8x32xf32>
    %124 = vector.broadcast %7 : vector<1x32xf32> to vector<8x32xf32>
    %125 = arith.addf %123, %124 : vector<8x32xf32>
    %cst_46 = arith.constant dense<0.000000e+00> : vector<8xf32>
    %126 = vector.multi_reduction <add>, %125, %cst_46 [1] : vector<8x32xf32> to vector<8xf32>
    %127 = vector.shape_cast %126 : vector<8xf32> to vector<8x1xf32>
    %cst_47 = arith.constant 3.200000e+01 : f32
    %128 = vector.broadcast %cst_47 : f32 to vector<8x1xf32>
    %129 = arith.divf %127, %128 : vector<8x1xf32>
    %130 = vector.broadcast %129 : vector<8x1xf32> to vector<8x32xf32>
    %131 = arith.subf %125, %130 : vector<8x32xf32>
    %132 = arith.mulf %131, %131 : vector<8x32xf32>
    %cst_48 = arith.constant dense<0.000000e+00> : vector<8xf32>
    %133 = vector.multi_reduction <add>, %132, %cst_48 [1] : vector<8x32xf32> to vector<8xf32>
    %134 = vector.shape_cast %133 : vector<8xf32> to vector<8x1xf32>
    %cst_49 = arith.constant 3.200000e+01 : f32
    %135 = vector.broadcast %cst_49 : f32 to vector<8x1xf32>
    %136 = arith.divf %134, %135 : vector<8x1xf32>
    %137 = vector.broadcast %129 : vector<8x1xf32> to vector<8x32xf32>
    %138 = arith.subf %125, %137 : vector<8x32xf32>
    %cst_50 = arith.constant 9.99999974E-6 : f32
    %139 = vector.broadcast %cst_50 : f32 to vector<8x1xf32>
    %140 = arith.addf %136, %139 : vector<8x1xf32>
    %141 = math.rsqrt %140 : vector<8x1xf32>
    %142 = vector.broadcast %141 : vector<8x1xf32> to vector<8x32xf32>
    %143 = arith.mulf %138, %142 : vector<8x32xf32>
    %144 = vector.broadcast %8 : vector<1x32xf32> to vector<8x32xf32>
    %145 = arith.mulf %143, %144 : vector<8x32xf32>
    %146 = vector.broadcast %9 : vector<1x32xf32> to vector<8x32xf32>
    %147 = arith.addf %145, %146 : vector<8x32xf32>
    %cst_51 = arith.constant 5.000000e-01 : f32
    %148 = vector.broadcast %cst_51 : f32 to vector<8x32xf32>
    %149 = arith.mulf %148, %147 : vector<8x32xf32>
    %cst_52 = arith.constant 0.707106769 : f32
    %150 = vector.broadcast %cst_52 : f32 to vector<8x32xf32>
    %151 = arith.mulf %147, %150 : vector<8x32xf32>
    %cst_53 = arith.constant 0.000000e+00 : f32
    %152 = vector.broadcast %cst_53 : f32 to vector<8x32xf32>
    %153 = arith.cmpf oge, %151, %152 : vector<8x32xf32>
    %cst_54 = arith.constant 1.000000e+00 : f32
    %cst_55 = arith.constant -1.000000e+00 : f32
    %154 = vector.broadcast %cst_54 : f32 to vector<8x32xf32>
    %155 = vector.broadcast %cst_55 : f32 to vector<8x32xf32>
    %156 = arith.select %153, %154, %155 : vector<8x32xi1>, vector<8x32xf32>
    %157 = math.absf %151 : vector<8x32xf32>
    %cst_56 = arith.constant 0.327591091 : f32
    %158 = vector.broadcast %cst_56 : f32 to vector<8x32xf32>
    %159 = arith.mulf %158, %157 : vector<8x32xf32>
    %cst_57 = arith.constant 1.000000e+00 : f32
    %160 = vector.broadcast %cst_57 : f32 to vector<8x32xf32>
    %161 = arith.addf %160, %159 : vector<8x32xf32>
    %cst_58 = arith.constant 1.000000e+00 : f32
    %162 = vector.broadcast %cst_58 : f32 to vector<8x32xf32>
    %163 = arith.divf %162, %161 : vector<8x32xf32>
    %cst_59 = arith.constant 1.06140542 : f32
    %164 = vector.broadcast %cst_59 : f32 to vector<8x32xf32>
    %165 = arith.mulf %164, %163 : vector<8x32xf32>
    %cst_60 = arith.constant -1.45315206 : f32
    %166 = vector.broadcast %cst_60 : f32 to vector<8x32xf32>
    %167 = arith.addf %165, %166 : vector<8x32xf32>
    %168 = arith.mulf %167, %163 : vector<8x32xf32>
    %cst_61 = arith.constant 1.42141378 : f32
    %169 = vector.broadcast %cst_61 : f32 to vector<8x32xf32>
    %170 = arith.addf %168, %169 : vector<8x32xf32>
    %171 = arith.mulf %170, %163 : vector<8x32xf32>
    %cst_62 = arith.constant -0.284496725 : f32
    %172 = vector.broadcast %cst_62 : f32 to vector<8x32xf32>
    %173 = arith.addf %171, %172 : vector<8x32xf32>
    %174 = arith.mulf %173, %163 : vector<8x32xf32>
    %cst_63 = arith.constant 0.254829586 : f32
    %175 = vector.broadcast %cst_63 : f32 to vector<8x32xf32>
    %176 = arith.addf %174, %175 : vector<8x32xf32>
    %177 = arith.mulf %176, %163 : vector<8x32xf32>
    %cst_64 = arith.constant 0.000000e+00 : f32
    %178 = vector.broadcast %cst_64 : f32 to vector<8x32xf32>
    %179 = arith.subf %178, %157 : vector<8x32xf32>
    %180 = arith.mulf %179, %157 : vector<8x32xf32>
    %181 = math.exp %180 : vector<8x32xf32>
    %182 = arith.mulf %177, %181 : vector<8x32xf32>
    %cst_65 = arith.constant 1.000000e+00 : f32
    %183 = vector.broadcast %cst_65 : f32 to vector<8x32xf32>
    %184 = arith.subf %183, %182 : vector<8x32xf32>
    %185 = arith.mulf %156, %184 : vector<8x32xf32>
    %cst_66 = arith.constant 1.000000e+00 : f32
    %186 = vector.broadcast %cst_66 : f32 to vector<8x32xf32>
    %187 = arith.addf %186, %185 : vector<8x32xf32>
    %188 = arith.mulf %149, %187 : vector<8x32xf32>
    %189 = arith.addf %188, %0 : vector<8x32xf32>
    %c0_67 = arith.constant 0 : index
    %c0_68 = arith.constant 0 : index
    %190 = vector.load %arg9[%c0_67, %c0_68] : memref<8x32xf32, #tpu.memory_space<vmem>>, vector<8x32xf32>
    tpu.vector_store %arg9[%c0_67, %c0_68], %189 {strides = array<i32>} : memref<8x32xf32, #tpu.memory_space<vmem>>, vector<8x32xf32>,
    return
  }
  func.func @transform_0(%arg0: i32) -> (i32, i32) {
    %c0_i32 = arith.constant 0 : i32
    %c0_i32_0 = arith.constant 0 : i32
    return %arg0, %c0_i32 : i32, i32
  }
  func.func @transform_1(%arg0: i32) -> (i32, i32) {
    %c0_i32 = arith.constant 0 : i32
    %c0_i32_0 = arith.constant 0 : i32
    return %arg0, %c0_i32 : i32, i32
  }
  func.func @transform_2(%arg0: i32) -> (i32, i32) {
    %c0_i32 = arith.constant 0 : i32
    %c0_i32_0 = arith.constant 0 : i32
    return %arg0, %c0_i32 : i32, i32
  }
  func.func @transform_3(%arg0: i32) -> (i32, i32) {
    %c0_i32 = arith.constant 0 : i32
    %c0_i32_0 = arith.constant 0 : i32
    %c0_i32_1 = arith.constant 0 : i32
    return %c0_i32, %c0_i32_0 : i32, i32
  }
  func.func @transform_4(%arg0: i32) -> (i32, i32) {
    %c0_i32 = arith.constant 0 : i32
    %c0_i32_0 = arith.constant 0 : i32
    %c0_i32_1 = arith.constant 0 : i32
    return %c0_i32, %c0_i32_0 : i32, i32
  }
  func.func @transform_5(%arg0: i32) -> (i32, i32) {
    %c0_i32 = arith.constant 0 : i32
    %c0_i32_0 = arith.constant 0 : i32
    %c0_i32_1 = arith.constant 0 : i32
    return %c0_i32, %c0_i32_0 : i32, i32
  }
  func.func @transform_6(%arg0: i32) -> (i32, i32) {
    %c0_i32 = arith.constant 0 : i32
    %c0_i32_0 = arith.constant 0 : i32
    %c0_i32_1 = arith.constant 0 : i32
    return %c0_i32, %c0_i32_0 : i32, i32
  }
  func.func @transform_7(%arg0: i32) -> (i32, i32) {
    %c0_i32 = arith.constant 0 : i32
    %c0_i32_0 = arith.constant 0 : i32
    %c0_i32_1 = arith.constant 0 : i32
    return %c0_i32, %c0_i32_0 : i32, i32
  }
  func.func @transform_8(%arg0: i32) -> (i32, i32) {
    %c0_i32 = arith.constant 0 : i32
    %c0_i32_0 = arith.constant 0 : i32
    return %arg0, %c0_i32 : i32, i32
  }
}

</mosaic_0001>

<bundles_post_ra>
// kernel: resblock_forward.1
= control target key start
LH: loop header
LB: loop body
LE: loop exit
PB: predicated region body
PF: predicated region fallthrough
CT: control target
= control target key end

     0   :  { %13 = vsyncpa [#allocation3], 0  ;;  %s805_s0 = inlined_call_operand.vmem [shape: f32[8,32], index: 0, kind: input, shape index: {}]   ;;  %s806_s1 = inlined_call_operand.vmem [shape: f32[8,16], index: 1, kind: input, shape index: {}]   ;;  %s807_s2 = inlined_call_operand.vmem [shape: f32[8,24], index: 2, kind: input, shape index: {}]   ;;  %s808_s3 = inlined_call_operand.vmem [shape: bf16[16,64], index: 3, kind: input, shape index: {}]   ;;  %s809_s4 = inlined_call_operand.vmem [shape: bf16[24,32], index: 4, kind: input, shape index: {}]   ;;  %s810_s5 = inlined_call_operand.vmem [shape: bf16[64,32], index: 5, kind: input, shape index: {}]   ;;  %s811_s6 = inlined_call_operand.vmem [shape: bf16[32,32], index: 6, kind: input, shape index: {}]   ;;  %s812_s7 = inlined_call_operand.hbm [shape: f32[8,64], index: 7, kind: input, shape index: {}]   ;;  %s813_s8 = inlined_call_operand.hbm [shape: f32[8,32], index: 8, kind: output, shape index: {}]  }
   0x1   :  { %14 = vsyncpa [#allocation4], 0  ;;  %s634_s27 = smov [#allocation2]   ;;  %s586_s9 = scalar_lea.hbm %s812_s7, 128 }
   0x2   :  { %s35_s28 = sshll.u32 %s634_s27, 4  ;;  %p587_p0 = scmp.ne.s32.totalorder %s812_s7, %s586_s9  ;;  %s36_s28 = int_to_ptr.vmem [resolvable:$true] %s35_s28 }
   0x3   :  { %p590_p1 = scmp.lt.u32.totalorder %s586_s9, %s812_s7 }
   0x5   :  { %p592_p2 = pnand %p590_p1, %p587_p0 }
   0x7   :  { %595 = shalt.err (!%p592_p2)
}
   0x8   :  { %s596_s14 = scalar_lea.vmem %s36_s28, 128  ;;  %p601_p4 = scmp.lt.s32.totalorder %s36_s28, %s36_s28 }
   0x9   :  { %p597_p3 = scmp.ne.s32.totalorder %s36_s28, %s596_s14  ;;  %p602_p5 = scmp.lt.s32.totalorder %s596_s14, %s596_s14 }
   0xb   :  { %p603_p6 = por %p602_p5, %p601_p4 }
   0xd   :  { %p604_p7 = pnand %p603_p6, %p597_p3 }
   0xf   :  { %607 = shalt.err (!%p604_p7)
}
  0x10   :  { %38 = dma.hbm_to_vmem [thread:$0]  %s812_s7, 128, %s36_s28, [#allocation3]  }
  0x11   :  { %630 = dma.done.wait [#allocation3], 128  }
  0x12   :  { %631 = vsyncadd [#allocation3], 4294967168  ;;  %v635_v0 = vmov 0.0   ;;  %vm636_vm0 = vmmov 0   ;;  %v563_v1 = vld [vmem:[%s809_s4] sm:$0xff]   ;;  %vm133_vm1 = vcmask 1043456   ;;  %v58_v6 = vlaneseq }
  0x13   :  { %525 = vmatprep.subr.bf16.mxu1 %v635_v0  ;;  %529 = vmatprep.mubr.msk.bf16.mxu1 %vm636_vm0, %v635_v0  ;;  %v564_v2 = vld [vmem:[%s809_s4 + $0x8] ss:$0 sps:$4 sm:$0xff]   ;;  %v45_v3 = vld [vmem:[%s807_s2] sm:$0xff]  ;;  %vm129_vm2 = vcmask 195584   ;;  %vm177_vm3 = vcmask 261120   ;;  %vm68_vm4 = vcmask 130048  }
  0x14   :  { %519 = vmatprep.subr.bf16.mxu0 %v635_v0  ;;  %521 = vmatprep.mubr.msk.bf16.mxu0 %vm636_vm0, %v635_v0  ;;  %v135_v4 = vsel %vm133_vm1, %v564_v2, 0  ;;  %v112_v5 = vpack.c.bf16 %v45_v3, %v45_v3  ;;  %v716_v7 = vshrl.u32 %v58_v6, 7  ;;  %v719_v9 = vld [vmem:[#allocation2] sm:$0xff]  ;;  %v567_v26 = vld [vmem:[%s810_s5 + $0x10] sm:$0xff]   ;;  %v568_v27 = vld [vmem:[%s810_s5 + $0x8] sm:$0xff]  }
  0x15   :  { %526 = vmatpush3.bf16.msra.mxu1 %v563_v1  ;;  %v565_v22 = vld [vmem:[%s808_s3] sm:$0xff]   ;;  %v569_v29 = vld [vmem:[%s810_s5 + $0x18] sm:$0xff]   ;;  %v571_v6 = vld [vmem:[%s811_s6 + $0x8] sm:$0xff]  }
  0x16   :  { %527 = vmatprep.subr.bf16.mxu1 %v635_v0  ;;  %v118_v8 = vsub.s32 1, %v716_v7  ;;  %520 = vmatpush3.bf16.msra.mxu0 %v565_v22  ;;  %v44_v23 = vld [vmem:[%s806_s1] sm:$0xff]  ;;  %v194_v34 = vsub.s32 4, %v716_v7  ;;  %v199_v35 = vsub.s32 5, %v716_v7  ;;  %v60_v43 = vsub.s32 0, %v716_v7 }
  0x17   :  { %v55_v24 = vpack.c.bf16 %v44_v23, %v44_v23  ;;  %533 = vmatprep.subr.bf16.mxu0 %v635_v0  ;;  %v566_v25 = vld [vmem:[%s810_s5] sm:$0xff]   ;;  %v316_v54 = vsub.s32 2, %v716_v7 }
  0x18   :  { %v119_v10 = vrot.slane %v719_v9, %v118_v8  ;;  %v746_v28 = vld [vmem:[%s805_s0] sm:$0xff]  ;;  %v759_v36 = vrot.slane %v719_v9, %v194_v34  ;;  %v762_v39 = vrot.slane %v719_v9, %v199_v35  ;;  %v61_v44 = vrot.slane %v719_v9, %v60_v43  ;;  %s637_s0 = smov 96  }
  0x19   :  { %528 = vmatpush3.bf16.msra.mxu1 %v135_v4  ;;  %522 = vmatmul.mubr.msk.bf16.vlgmr.msra.gmra.mrb[0].mxu0 %vm68_vm4, %v55_v24  ;;  %v202_v30 = vpack.c.bf16 %v746_v28, %v746_v28  ;;  %v317_v55 = vrot.slane %v719_v9, %v316_v54 }
  0x1a   :  { %541 = vmatprep.subr.bf16.mxu1 %v635_v0  ;;  %537 = vmatprep.mubr.msk.bf16.mxu0 %vm636_vm0, %v635_v0 }
  0x1b   :  { %534 = vmatpush3.bf16.msra.mxu0 %v567_v26 }
  0x1c   :  { %530 = vmatmul.mubr.msk.bf16.vlgmr.msra.gmra.mrb[0].mxu1 %vm129_vm2, %v112_v5  ;;  %535 = vmatprep.subr.bf16.mxu0 %v635_v0  ;;  %v570_v5 = vld [vmem:[%s811_s6] sm:$0xff]   ;;  %s639_s6 = smov [#allocation5]  }
  0x1d   :  { %545 = vmatprep.mubr.msk.bf16.mxu1 %vm636_vm0, %v635_v0  ;;  %542 = vmatpush3.bf16.msra.mxu1 %v566_v25  ;;  %s482_s13 = sshll.u32 %s639_s6, 4  ;;  %s483_s13 = int_to_ptr.vmem [resolvable:$true] %s482_s13 }
  0x1e   :  { %543 = vmatprep.subr.bf16.mxu1 %v635_v0  ;;  %s608_s14 = scalar_lea.vmem %s483_s13, 128  ;;  %p613_p9 = scmp.lt.s32.totalorder %s483_s13, %s483_s13 }
  0x1f   :  { %536 = vmatpush3.bf16.msra.mxu0 %v569_v29  ;;  %p609_p8 = scmp.ne.s32.totalorder %s483_s13, %s608_s14  ;;  %p614_p10 = scmp.lt.s32.totalorder %s608_s14, %s608_s14 }
  0x20   :  { %549 = vmatprep.subr.bf16.mxu0 %v635_v0 }
  0x21   :  { %544 = vmatpush3.bf16.msra.mxu1 %v568_v27  ;;  %p615_p11 = por %p614_p10, %p613_p9 }
  0x23   :  { %p616_p12 = pnand %p615_p11, %p609_p8 }
  0x24   :  { %546 = vmatmul.mubr.msk.bf16.vlgmr.msra.gmra.mrb[4].mxu1 %vm177_vm3, %v202_v30 }
  0xec   :  { %v106_v45 = vpop.f32.mrb[0].mxu0 }
  0xed   :  { %v107_v46 = vadd.f32 %v106_v45, %v61_v44  ;;  %v523_v47 = vpop.f32.mrb[1].mxu0 }
  0xee   :  { %v109_v48 = vpop.f32.mrb[2].mxu0 }
  0xef   :  { %v171_v11 = vpop.f32.mrb[0].mxu1  ;;  %v524_v49 = vpop.f32.mrb[3].mxu0 }
  0xf0   :  { %v172_v12 = vadd.f32 %v171_v11, %v119_v10  ;;  %v531_v13 = vpop.f32.mrb[1].mxu1  ;;  %v375_v49 = vsub.s32 3, %v716_v7 }
  0xf1   :  { %v174_v14 = vpop.f32.mrb[2].mxu1 }
  0xf2   :  { %v532_v15 = vpop.f32.mrb[3].mxu1  ;;  %v178_v16 = vsel %vm177_vm3, %v172_v12, 0.0 }
  0xf3   :  { %179 = vadd.xlane.f32.xlu0 %v178_v16  ;;  %v334_v15 = vadd.f32 1.0, %v107_v46 }
  0xf7   :  { %v308_v50 = vpop.f32.mrb[4].mxu1 }
  0xf8   :  { %v547_v51 = vpop.f32.mrb[5].mxu1 }
  0xf9   :  { %v311_v52 = vpop.f32.mrb[6].mxu1 }
  0xfa   :  { %v548_v53 = vpop.f32.mrb[7].mxu1 }
 0x180   :  { %v180_v17 = vpop.xlane.xlu0 %179 }
 0x181   :  { %v182_v18 = vmul.f32 0.03125, %v180_v17 }
 0x183   :  { %v183_v19 = vsub.f32 %v172_v12, %v182_v18 }
 0x185   :  { %v184_v20 = vmul.f32 %v183_v19, %v183_v19 }
 0x187   :  { %v185_v21 = vsel %vm177_vm3, %v184_v20, 0.0 }
 0x188   :  { %186 = vadd.xlane.f32.xlu0 %v185_v21 }
 0x19e   :  { %337 = vrot.lane.b32.xlu0 %v107_v46, %s637_s0 }
 0x215   :  { %v187_v31 = vpop.xlane.xlu0 %186 }
 0x216   :  { %v188_v32 = vmul.f32 0.03125, %v187_v31 }
 0x218   :  { %v189_v33 = vadd.f32 1e-05, %v188_v32 }
 0x219   :  { %v338_v18 = vpop.permute.xlu0 %337 }
 0x21a   :  { %572 = vrsqrt.f32 %v189_v33 }
 0x224   :  { %v573_v37 = vpop.eup %572 }
 0x225   :  { %v191_v38 = vmul.f32 %v573_v37, %v183_v19 }
 0x227   :  { %v196_v40 = vmul.f32 %v759_v36, %v191_v38 }
 0x229   :  { %v201_v41 = vadd.f32 %v762_v39, %v196_v40 }
 0x22b   :  { %v203_v42 = vpack.c.bf16 %v201_v41, %v201_v41 }
 0x22d   :  { %538 = vmatmul.mubr.msk.bf16.vlgmr.msra.gmra.mrb[4].mxu0 %vm177_vm3, %v203_v42  ;;  %v638_v42 = vmov -1.0  }
 0x22e   :  { %553 = vmatprep.mubr.msk.bf16.mxu0 %vm636_vm0, %v635_v0  ;;  %550 = vmatpush3.bf16.msra.mxu0 %v570_v5 }
 0x22f   :  { %551 = vmatprep.subr.bf16.mxu0 %v635_v0 }
 0x232   :  { %552 = vmatpush3.bf16.msra.mxu0 %v571_v6 }
 0x300   :  { %v253_v56 = vpop.f32.mrb[4].mxu0 }
 0x301   :  { %v309_v57 = vadd.f32 %v308_v50, %v253_v56  ;;  %v539_v58 = vpop.f32.mrb[5].mxu0  ;;  %v376_v50 = vrot.slane %v719_v9, %v375_v49 }
 0x302   :  { %v256_v59 = vpop.f32.mrb[6].mxu0 }
 0x303   :  { %v540_v60 = vpop.f32.mrb[7].mxu0  ;;  %v318_v61 = vadd.f32 %v317_v55, %v309_v57 }
 0x305   :  { %v319_v62 = vsel %vm177_vm3, %v318_v61, 0.0 }
 0x306   :  { %320 = vadd.xlane.f32.xlu1 %v319_v62 }
 0x393   :  { %v321_v63 = vpop.xlane.xlu1 %320 }
 0x394   :  { %v322_v1 = vmul.f32 0.03125, %v321_v63 }
 0x396   :  { %v323_v2 = vsub.f32 %v318_v61, %v322_v1 }
 0x398   :  { %v324_v3 = vmul.f32 %v323_v2, %v323_v2 }
 0x39a   :  { %v325_v4 = vsel %vm177_vm3, %v324_v3, 0.0 }
 0x39b   :  { %326 = vadd.xlane.f32.xlu1 %v325_v4 }
 0x428   :  { %v327_v8 = vpop.xlane.xlu1 %326 }
 0x429   :  { %v328_v10 = vmul.f32 0.03125, %v327_v8 }
 0x42b   :  { %v329_v11 = vadd.f32 1e-05, %v328_v10 }
 0x42d   :  { %574 = vrsqrt.f32 %v329_v11 }
 0x437   :  { %v575_v12 = vpop.eup %574 }
 0x438   :  { %v331_v13 = vmul.f32 %v575_v12, %v323_v2 }
 0x43a   :  { %v332_v14 = vmul.f32 %v331_v13, %v759_v36 }
 0x43c   :  { %v333_v16 = vadd.f32 %v332_v14, %v762_v39 }
 0x43e   :  { %v335_v17 = vmul.f32 %v334_v15, %v333_v16 }
 0x440   :  { %v340_v19 = vadd.f32 %v338_v18, %v335_v17 }
 0x442   :  { %v342_v20 = vmul.f32 0.70710677, %v340_v19  ;;  %v341_v45 = vmul.f32 0.5, %v340_v19 }
 0x444   :  { %v345_v21 = vand.u32 2147483647, %v342_v20  ;;  %vm343_vm5 = vcmp.ge.f32.partialorder %v342_v20, 0.0 }
 0x445   :  { %v344_v43 = vsel %vm343_vm5, 1.0, %v638_v42 }
 0x446   :  { %v346_v22 = vmul.f32 0.3275911, %v345_v21  ;;  %v359_v0 = vsub.f32 0.0, %v345_v21 }
 0x448   :  { %v347_v23 = vadd.f32 1.0, %v346_v22  ;;  %v360_v25 = vmul.f32 %v359_v0, %v345_v21 }
 0x44a   :  { %576 = vrcp.f32 %v347_v23  ;;  %v361_v29 = vmul.f32 1.442695, %v360_v25 }
 0x44c   :  { %578 = vpow2.f32 %v361_v29 }
 0x454   :  { %v577_v24 = vpop.eup %576 }
 0x455   :  { %v350_v26 = vmul.f32 1.0614054, %v577_v24 }
 0x456   :  { %v579_v38 = vpop.eup %578 }
 0x457   :  { %v351_v27 = vadd.f32 -1.4531521, %v350_v26 }
 0x459   :  { %v352_v30 = vmul.f32 %v577_v24, %v351_v27 }
 0x45b   :  { %v353_v31 = vadd.f32 1.4214138, %v352_v30 }
 0x45d   :  { %v354_v32 = vmul.f32 %v577_v24, %v353_v31 }
 0x45f   :  { %v355_v33 = vadd.f32 -0.28449672, %v354_v32 }
 0x461   :  { %v356_v34 = vmul.f32 %v577_v24, %v355_v33 }
 0x463   :  { %v357_v35 = vadd.f32 0.2548296, %v356_v34 }
 0x465   :  { %v358_v37 = vmul.f32 %v577_v24, %v357_v35 }
 0x467   :  { %v363_v40 = vmul.f32 %v579_v38, %v358_v37 }
 0x469   :  { %v364_v41 = vsub.f32 1.0, %v363_v40 }
 0x46b   :  { %v365_v44 = vmul.f32 %v364_v41, %v344_v43 }
 0x46d   :  { %v366_v46 = vadd.f32 1.0, %v365_v44 }
 0x46f   :  { %v367_v47 = vmul.f32 %v366_v46, %v341_v45 }
 0x471   :  { %v368_v48 = vpack.c.bf16 %v367_v47, %v367_v47 }
 0x473   :  { %554 = vmatmul.mubr.msk.bf16.vlgmr.msra.gmra.mrb[8].mxu0 %vm177_vm3, %v368_v48 }
 0x546   :  { %v426_v51 = vpop.f32.mrb[8].mxu0 }
 0x547   :  { %v427_v52 = vadd.f32 %v426_v51, %v376_v50  ;;  %v555_v53 = vpop.f32.mrb[9].mxu0 }
 0x548   :  { %v429_v54 = vpop.f32.mrb[10].mxu0 }
 0x549   :  { %v556_v55 = vpop.f32.mrb[11].mxu0  ;;  %v432_v56 = vsel %vm177_vm3, %v427_v52, 0.0 }
 0x54a   :  { %433 = vadd.xlane.f32.xlu1 %v432_v56 }
 0x5d7   :  { %v434_v57 = vpop.xlane.xlu1 %433 }
 0x5d8   :  { %v435_v58 = vmul.f32 0.03125, %v434_v57 }
 0x5da   :  { %v436_v59 = vsub.f32 %v427_v52, %v435_v58 }
 0x5dc   :  { %v437_v60 = vmul.f32 %v436_v59, %v436_v59 }
 0x5de   :  { %v438_v61 = vsel %vm177_vm3, %v437_v60, 0.0 }
 0x5df   :  { %439 = vadd.xlane.f32.xlu1 %v438_v61 }
 0x66c   :  { %v440_v62 = vpop.xlane.xlu1 %439 }
 0x66d   :  { %v441_v63 = vmul.f32 0.03125, %v440_v62 }
 0x66f   :  { %v442_v7 = vadd.f32 1e-05, %v441_v63 }
 0x671   :  { %580 = vrsqrt.f32 %v442_v7 }
 0x67b   :  { %v581_v9 = vpop.eup %580 }
 0x67c   :  { %v444_v1 = vmul.f32 %v581_v9, %v436_v59 }
 0x67e   :  { %v445_v2 = vmul.f32 %v444_v1, %v759_v36 }
 0x680   :  { %v446_v3 = vadd.f32 %v445_v2, %v762_v39 }
 0x682   :  { %v448_v4 = vmul.f32 0.70710677, %v446_v3  ;;  %v447_v25 = vmul.f32 0.5, %v446_v3 }
 0x684   :  { %v451_v5 = vand.u32 2147483647, %v448_v4  ;;  %vm449_vm6 = vcmp.ge.f32.partialorder %v448_v4, 0.0 }
 0x685   :  { %v450_v0 = vsel %vm449_vm6, 1.0, %v638_v42 }
 0x686   :  { %v452_v6 = vmul.f32 0.3275911, %v451_v5  ;;  %v465_v10 = vsub.f32 0.0, %v451_v5 }
 0x688   :  { %v453_v8 = vadd.f32 1.0, %v452_v6  ;;  %v466_v12 = vmul.f32 %v465_v10, %v451_v5 }
 0x68a   :  { %582 = vrcp.f32 %v453_v8  ;;  %v467_v15 = vmul.f32 1.442695, %v466_v12 }
 0x68c   :  { %584 = vpow2.f32 %v467_v15 }
 0x694   :  { %v583_v11 = vpop.eup %582 }
 0x695   :  { %v456_v13 = vmul.f32 1.0614054, %v583_v11 }
 0x696   :  { %v585_v39 = vpop.eup %584 }
 0x697   :  { %v457_v14 = vadd.f32 -1.4531521, %v456_v13 }
 0x699   :  { %v458_v16 = vmul.f32 %v583_v11, %v457_v14 }
 0x69b   :  { %v459_v17 = vadd.f32 1.4214138, %v458_v16 }
 0x69d   :  { %v460_v18 = vmul.f32 %v583_v11, %v459_v17 }
 0x69f   :  { %v461_v19 = vadd.f32 -0.28449672, %v460_v18 }
 0x6a1   :  { %v462_v20 = vmul.f32 %v583_v11, %v461_v19 }
 0x6a3   :  { %v463_v36 = vadd.f32 0.2548296, %v462_v20 }
 0x6a5   :  { %v464_v21 = vmul.f32 %v583_v11, %v463_v36 }
 0x6a7   :  { %v469_v22 = vmul.f32 %v585_v39, %v464_v21 }
 0x6a9   :  { %v470_v23 = vsub.f32 1.0, %v469_v22 }
 0x6ab   :  { %v471_v24 = vmul.f32 %v470_v23, %v450_v0 }
 0x6ad   :  { %v472_v26 = vadd.f32 1.0, %v471_v24 }
 0x6af   :  { %v473_v27 = vmul.f32 %v472_v26, %v447_v25 }
 0x6b1   :  { %v474_v29 = vadd.f32 %v473_v27, %v746_v28 }
 0x6b3   :  { %475 = vst.msk [vmem:[#allocation5] sm:$0xff] %vm177_vm3, %v474_v29 }
 0x6b4   :  { %619 = shalt.err (!%p616_p12)
}
 0x6b5   :  { %s620_s17 = scalar_lea.hbm %s813_s8, 128 }
 0x6b6   :  { %p621_p13 = scmp.ne.s32.totalorder %s813_s8, %s620_s17  ;;  %p624_p0 = scmp.lt.u32.totalorder %s620_s17, %s813_s8 }
 0x6b8   :  { %p626_p1 = pnand %p624_p0, %p621_p13 }
 0x6ba   :  { %629 = shalt.err (!%p626_p1)
}
 0x6bb   :  { %485 = dma.vmem_to_hbm [thread:$0]  %s483_s13, 128, %s813_s8, [#allocation4]  }
 0x6bc   :  { %632 = dma.done.wait [#allocation4], 128  }
 0x6bd   :  { %633 = vsyncadd [#allocation4], 4294967168 }
 0x6be   :  { %489 = vsyncpa [#allocation3], 1 }
 0x6bf   :  { %490 = vsyncpa [#allocation4], 1 }

</bundles_post_ra>
